<compile_context>
chip_gen: v7x
topology: tpu7x:2x2x1
jax: 0.10.0
libtpu: 0.0.40
codegen_flags: <defaults>
</compile_context>

<pallas_src>
import jax
import jax.numpy as jnp
import numpy as np
from jax import lax
from jax.experimental import pallas as pl
from jax.experimental.pallas import tpu as pltpu


def basic_block_kernel(x_ref, w1_ref, s1_ref, b1_ref, w2_ref, s2_ref, b2_ref,
                       o_ref, pad_ref):
    """One image per grid step.

    x_ref  : [1, H, W*C]        lane-dense activation slab (f32)
    w*_ref : [3, (W+2)*C, W*C]  row-merged block-banded conv weights (bf16)
    s*,b*  : [1, W*C]           folded BN scale / bias, tiled over W (f32)
    o_ref  : [1, H, W*C]        output slab
    pad_ref: [H+2, (W+2)*C]     scratch; lanes [0:W*C] interior, [W*C:] halo
    """
    _, H, WC = x_ref.shape
    Hp, WpC = pad_ref.shape
    zdt = pad_ref.dtype

    # ---- zero only the 1-pixel halo (interior is fully overwritten below) ----
    pad_ref[0:1, :] = jnp.zeros((1, WpC), zdt)              # top halo row
    pad_ref[Hp - 1:Hp, :] = jnp.zeros((1, WpC), zdt)        # bottom halo row
    pad_ref[:, WC:WpC] = jnp.zeros((Hp, WpC - WC), zdt)     # left+right halo cols

    x_val = x_ref[0, :, :]                                  # [H, W*C] f32

    # ---- conv1 + BN1 + ReLU: 3 row-merged MXU matmuls (K=(W+2)*C, N=W*C) ----
    pad_ref[1:1 + H, 0:WC] = x_val.astype(zdt)              # lane-aligned store
    acc = jnp.zeros((H, WC), jnp.float32)
    for dy in range(3):                                     # static 3-tap unroll
        acc = acc + jnp.dot(pad_ref[dy:dy + H, :], w1_ref[dy],
                            preferred_element_type=jnp.float32)
    out1 = jnp.maximum(acc * s1_ref[...] + b1_ref[...], 0.0)

    # ---- conv2 + BN2: reuse the same padded slab (halo is still zero) ----
    pad_ref[1:1 + H, 0:WC] = out1.astype(zdt)
    acc2 = jnp.zeros((H, WC), jnp.float32)
    for dy in range(3):
        acc2 = acc2 + jnp.dot(pad_ref[dy:dy + H, :], w2_ref[dy],
                              preferred_element_type=jnp.float32)
    out2 = acc2 * s2_ref[...] + b2_ref[...]

    # ---- residual add (exact f32 identity from x_ref) + final ReLU ----
    res = jnp.maximum(out2 + x_val.astype(jnp.float32), 0.0)
    o_ref[0, :, :] = res.astype(o_ref.dtype)


def _row_merged_weight(w, W, mm_dtype):
    """OIHW [Cout, Cin, 3, 3] -> [3, (W+2)*Cin, W*Cout] block-banded weight.

    Row (lane-of-input) index layout matches the kernel's padded slab:
    interior padded position p in [1, W] -> (p-1)*Cin + ci, left halo p=0 ->
    W*Cin + ci, right halo p=W+1 -> W*Cin + Cin + ci.
    """
    Cout, Cin = w.shape[0], w.shape[1]
    wt = jnp.transpose(w, (2, 3, 1, 0)).reshape(3, 3 * Cin, Cout)  # [dy, dx*Cin+ci, co]
    wt = wt.astype(jnp.float32)

    p = jnp.arange(W + 2)
    base = jnp.where(p == 0, W * Cin,
                     jnp.where(p == W + 1, W * Cin + Cin, (p - 1) * Cin))
    xs = jnp.arange(W)
    rowidx = (base[xs[:, None, None] + jnp.arange(3)[None, :, None]]
              + jnp.arange(Cin)[None, None, :]).reshape(W, 3 * Cin)   # [W, k]
    r = jnp.arange((W + 2) * Cin)
    place = (rowidx[:, :, None] == r[None, None, :]).astype(jnp.float32)  # [W,k,r]
    wrow = jnp.einsum('wkr,dko->drwo', place, wt)                     # [3, r, W, co]
    return wrow.reshape(3, (W + 2) * Cin, W * Cout).astype(mm_dtype)


def basic_block_forward(x_nchw, w1, g1, be1, m1, v1, w2, g2, be2, m2, v2,
                        eps=1e-5):
    """NCHW in / NCHW out. Matches PyTorch BasicBlock(inplanes, planes,
    stride=1, downsample=None) in eval mode."""
    N, C, H, W = x_nchw.shape
    Cout = w1.shape[0]
    assert w1.shape == (Cout, C, 3, 3) and w2.shape == (Cout, Cout, 3, 3)
    assert Cout == C, "kernel covers stride=1 / downsample=None (inplanes == planes)"

    WC = W * C
    WpC = (W + 2) * C
    mm_dtype = jnp.bfloat16            # MXU input dtype; accumulation is f32

    # NCHW -> lane-dense [N, H, W*C] slab (layout plumbing at the boundary)
    x = jnp.transpose(x_nchw, (0, 2, 3, 1)).reshape(N, H, WC)

    def fold_bn(gamma, beta, mean, var):
        scale = gamma / jnp.sqrt(var + eps)
        bias = beta - mean * scale
        return (jnp.tile(scale, W).reshape(1, WC).astype(jnp.float32),
                jnp.tile(bias, W).reshape(1, WC).astype(jnp.float32))

    s1, b1 = fold_bn(g1, be1, m1, v1)
    s2, b2 = fold_bn(g2, be2, m2, v2)
    w1r = _row_merged_weight(w1, W, mm_dtype)
    w2r = _row_merged_weight(w2, W, mm_dtype)

    flops = 2 * 3 * 2 * N * H * WpC * WC              # both convs, MXU MACs * 2
    bytes_accessed = (2 * N * H * WC * 4              # x in + out (f32)
                      + 2 * 3 * WpC * WC * 2          # both bf16 weight stacks
                      + 4 * WC * 4)                   # BN scale/bias vectors

    out2d = pl.pallas_call(
        basic_block_kernel,
        out_shape=jax.ShapeDtypeStruct((N, H, WC), x_nchw.dtype),
        grid_spec=pltpu.PrefetchScalarGridSpec(
            num_scalar_prefetch=0,
            grid=(N,),                                 # TODO(synk): also tile H at real sizes
            in_specs=[
                pl.BlockSpec((1, H, WC), lambda n: (n, 0, 0)),      # x slab
                pl.BlockSpec((3, WpC, WC), lambda n: (0, 0, 0)),    # w1 (resident)
                pl.BlockSpec((1, WC), lambda n: (0, 0)),            # s1
                pl.BlockSpec((1, WC), lambda n: (0, 0)),            # b1
                pl.BlockSpec((3, WpC, WC), lambda n: (0, 0, 0)),    # w2 (resident)
                pl.BlockSpec((1, WC), lambda n: (0, 0)),            # s2
                pl.BlockSpec((1, WC), lambda n: (0, 0)),            # b2
            ],
            out_specs=pl.BlockSpec((1, H, WC), lambda n: (n, 0, 0)),
            scratch_shapes=[pltpu.VMEM((H + 2, WpC), mm_dtype)],
        ),
        compiler_params=pltpu.CompilerParams(
            dimension_semantics=("parallel",),         # megacore on v7x
            vmem_limit_bytes=32 * 1024 * 1024,
        ),
        cost_estimate=pl.CostEstimate(
            flops=flops, transcendentals=0, bytes_accessed=bytes_accessed),
    )(x, w1r, s1, b1, w2r, s2, b2)

    return jnp.transpose(out2d.reshape(N, H, W, C), (0, 3, 1, 2))


def reference_forward(x, w1, g1, be1, m1, v1, w2, g2, be2, m2, v2, eps=1e-5):
    """Plain-JAX reference (NCHW), mirrors the PyTorch forward in eval mode."""
    def conv(x, w):
        return lax.conv_general_dilated(
            x, w, window_strides=(1, 1), padding=((1, 1), (1, 1)),
            dimension_numbers=('NCHW', 'OIHW', 'NCHW'))

    def bn(x, g, b, m, v):
        g, b, m, v = (t[None, :, None, None] for t in (g, b, m, v))
        return (x - m) / jnp.sqrt(v + eps) * g + b

    out = jax.nn.relu(bn(conv(x, w1), g1, be1, m1, v1))
    out = bn(conv(out, w2), g2, be2, m2, v2)
    return jax.nn.relu(out + x)


if __name__ == "__main__":
    # BasicBlock(inplanes=8, planes=8, stride=1, downsample=None); W*C == 128
    N, C, H, W = 2, 8, 16, 16
    key = jax.random.PRNGKey(0)
    keys = jax.random.split(key, 11)

    x = jax.random.normal(keys[0], (N, C, H, W), jnp.float32)

    w1 = 0.1 * jax.random.normal(keys[1], (C, C, 3, 3), jnp.float32)
    g1 = 1.0 + 0.1 * jax.random.normal(keys[2], (C,), jnp.float32)
    be1 = 0.1 * jax.random.normal(keys[3], (C,), jnp.float32)
    m1 = 0.1 * jax.random.normal(keys[4], (C,), jnp.float32)
    v1 = 1.0 + 0.1 * jax.nn.softplus(jax.random.normal(keys[5], (C,), jnp.float32))

    w2 = 0.1 * jax.random.normal(keys[6], (C, C, 3, 3), jnp.float32)
    g2 = 1.0 + 0.1 * jax.random.normal(keys[7], (C,), jnp.float32)
    be2 = 0.1 * jax.random.normal(keys[8], (C,), jnp.float32)
    m2 = 0.1 * jax.random.normal(keys[9], (C,), jnp.float32)
    v2 = 1.0 + 0.1 * jax.nn.softplus(jax.random.normal(keys[10], (C,), jnp.float32))

    params = (w1, g1, be1, m1, v1, w2, g2, be2, m2, v2)

    fwd = jax.jit(basic_block_forward)
    out = jax.block_until_ready(fwd(x, *params))

    ref = jax.block_until_ready(reference_forward(x, *params))
    # Tolerance sized for bf16 MXU inputs (8-bit mantissa) across two 72-term
    # contractions with f32 accumulation; pointwise/residual math is exact f32.
    np.testing.assert_allclose(np.asarray(out), np.asarray(ref),
                               rtol=2e-2, atol=2e-2)
    print("KERNEL_OK")
</pallas_src>

<mosaic_0001>
module attributes {stable_mosaic.version = 11 : i64} {
  func.func @basic_block_kernel(%arg0: i32, %arg1: memref<1x16x128xf32, #tpu.memory_space<vmem>>, %arg2: memref<3x144x128xbf16, #tpu.memory_space<vmem>>, %arg3: memref<1x128xf32, #tpu.memory_space<vmem>>, %arg4: memref<1x128xf32, #tpu.memory_space<vmem>>, %arg5: memref<3x144x128xbf16, #tpu.memory_space<vmem>>, %arg6: memref<1x128xf32, #tpu.memory_space<vmem>>, %arg7: memref<1x128xf32, #tpu.memory_space<vmem>>, %arg8: memref<1x16x128xf32, #tpu.memory_space<vmem>>, %arg9: memref<18x144xbf16, #tpu.memory_space<vmem>>) attributes {dimension_semantics = [#tpu.dimension_semantics<parallel>], iteration_bounds = array<i64: 2>, scalar_prefetch = 0 : i64, scratch_operands = 1 : i64, tpu.core_type = #tpu.core_type<tc>, window_params = [{transform_indices = @transform_0, window_bounds = array<i64: 1, 16, 128>}, {pipeline_mode = #tpu.pipeline_mode<synchronous>, transform_indices = @transform_1, window_bounds = array<i64: 3, 144, 128>}, {pipeline_mode = #tpu.pipeline_mode<synchronous>, transform_indices = @transform_2, window_bounds = array<i64: 1, 128>}, {pipeline_mode = #tpu.pipeline_mode<synchronous>, transform_indices = @transform_3, window_bounds = array<i64: 1, 128>}, {pipeline_mode = #tpu.pipeline_mode<synchronous>, transform_indices = @transform_4, window_bounds = array<i64: 3, 144, 128>}, {pipeline_mode = #tpu.pipeline_mode<synchronous>, transform_indices = @transform_5, window_bounds = array<i64: 1, 128>}, {pipeline_mode = #tpu.pipeline_mode<synchronous>, transform_indices = @transform_6, window_bounds = array<i64: 1, 128>}, {transform_indices = @transform_7, window_bounds = array<i64: 1, 16, 128>}]} {
    %cst = arith.constant 0.000000e+00 : bf16
    %0 = vector.broadcast %cst : bf16 to vector<1x144xbf16>
    %c0 = arith.constant 0 : index
    %c0_0 = arith.constant 0 : index
    %1 = vector.load %arg9[%c0, %c0_0] : memref<18x144xbf16, #tpu.memory_space<vmem>>, vector<1x144xbf16>
    tpu.vector_store %arg9[%c0, %c0_0], %0 {strides = array<i32>} : memref<18x144xbf16, #tpu.memory_space<vmem>>, vector<1x144xbf16>,
    %cst_1 = arith.constant 0.000000e+00 : bf16
    %2 = vector.broadcast %cst_1 : bf16 to vector<1x144xbf16>
    %c17 = arith.constant 17 : index
    %c0_2 = arith.constant 0 : index
    %3 = vector.load %arg9[%c17, %c0_2] : memref<18x144xbf16, #tpu.memory_space<vmem>>, vector<1x144xbf16>
    tpu.vector_store %arg9[%c17, %c0_2], %2 {strides = array<i32>} : memref<18x144xbf16, #tpu.memory_space<vmem>>, vector<1x144xbf16>,
    %cst_3 = arith.constant 0.000000e+00 : bf16
    %4 = vector.broadcast %cst_3 : bf16 to vector<18x16xbf16>
    %c0_4 = arith.constant 0 : index
    %c128 = arith.constant 128 : index
    %5 = vector.load %arg9[%c0_4, %c128] : memref<18x144xbf16, #tpu.memory_space<vmem>>, vector<18x16xbf16>
    tpu.vector_store %arg9[%c0_4, %c128], %4 {strides = array<i32>} : memref<18x144xbf16, #tpu.memory_space<vmem>>, vector<18x16xbf16>,
    %c0_5 = arith.constant 0 : index
    %c0_6 = arith.constant 0 : index
    %c0_7 = arith.constant 0 : index
    %6 = vector.load %arg1[%c0_5, %c0_6, %c0_7] : memref<1x16x128xf32, #tpu.memory_space<vmem>>, vector<1x16x128xf32>
    %7 = vector.shape_cast %6 : vector<1x16x128xf32> to vector<16x128xf32>
    %8 = arith.truncf %7 : vector<16x128xf32> to vector<16x128xbf16>
    %c1 = arith.constant 1 : index
    %c0_8 = arith.constant 0 : index
    %9 = vector.load %arg9[%c1, %c0_8] : memref<18x144xbf16, #tpu.memory_space<vmem>>, vector<16x128xbf16>
    tpu.vector_store %arg9[%c1, %c0_8], %8 {strides = array<i32>} : memref<18x144xbf16, #tpu.memory_space<vmem>>, vector<16x128xbf16>,
    %cst_9 = arith.constant 0.000000e+00 : f32
    %10 = vector.broadcast %cst_9 : f32 to vector<16x128xf32>
    %c0_10 = arith.constant 0 : index
    %c0_11 = arith.constant 0 : index
    %11 = vector.load %arg9[%c0_10, %c0_11] : memref<18x144xbf16, #tpu.memory_space<vmem>>, vector<16x144xbf16>
    %c0_12 = arith.constant 0 : index
    %c0_13 = arith.constant 0 : index
    %c0_14 = arith.constant 0 : index
    %12 = vector.load %arg2[%c0_12, %c0_13, %c0_14] : memref<3x144x128xbf16, #tpu.memory_space<vmem>>, vector<1x144x128xbf16>
    %13 = vector.shape_cast %12 : vector<1x144x128xbf16> to vector<144x128xbf16>
    %cst_15 = arith.constant dense<0.000000e+00> : vector<16x128xf32>
    %14 = tpu.matmul %11, %13, %cst_15 {dimension_numbers = #tpu.dot_dimension_numbers<[1], [0], [0], [1], [0, 0, 1, 1], [], []>} : vector<16x144xbf16>, vector<144x128xbf16>, vector<16x128xf32> -> vector<16x128xf32>
    %15 = arith.addf %10, %14 : vector<16x128xf32>
    %c1_16 = arith.constant 1 : index
    %c0_17 = arith.constant 0 : index
    %16 = vector.load %arg9[%c1_16, %c0_17] : memref<18x144xbf16, #tpu.memory_space<vmem>>, vector<16x144xbf16>
    %c1_18 = arith.constant 1 : index
    %c0_19 = arith.constant 0 : index
    %c0_20 = arith.constant 0 : index
    %17 = vector.load %arg2[%c1_18, %c0_19, %c0_20] : memref<3x144x128xbf16, #tpu.memory_space<vmem>>, vector<1x144x128xbf16>
    %18 = vector.shape_cast %17 : vector<1x144x128xbf16> to vector<144x128xbf16>
    %cst_21 = arith.constant dense<0.000000e+00> : vector<16x128xf32>
    %19 = tpu.matmul %16, %18, %cst_21 {dimension_numbers = #tpu.dot_dimension_numbers<[1], [0], [0], [1], [0, 0, 1, 1], [], []>} : vector<16x144xbf16>, vector<144x128xbf16>, vector<16x128xf32> -> vector<16x128xf32>
    %20 = arith.addf %15, %19 : vector<16x128xf32>
    %c2 = arith.constant 2 : index
    %c0_22 = arith.constant 0 : index
    %21 = vector.load %arg9[%c2, %c0_22] : memref<18x144xbf16, #tpu.memory_space<vmem>>, vector<16x144xbf16>
    %c2_23 = arith.constant 2 : index
    %c0_24 = arith.constant 0 : index
    %c0_25 = arith.constant 0 : index
    %22 = vector.load %arg2[%c2_23, %c0_24, %c0_25] : memref<3x144x128xbf16, #tpu.memory_space<vmem>>, vector<1x144x128xbf16>
    %23 = vector.shape_cast %22 : vector<1x144x128xbf16> to vector<144x128xbf16>
    %cst_26 = arith.constant dense<0.000000e+00> : vector<16x128xf32>
    %24 = tpu.matmul %21, %23, %cst_26 {dimension_numbers = #tpu.dot_dimension_numbers<[1], [0], [0], [1], [0, 0, 1, 1], [], []>} : vector<16x144xbf16>, vector<144x128xbf16>, vector<16x128xf32> -> vector<16x128xf32>
    %25 = arith.addf %20, %24 : vector<16x128xf32>
    %c0_27 = arith.constant 0 : index
    %c0_28 = arith.constant 0 : index
    %26 = vector.load %arg3[%c0_27, %c0_28] : memref<1x128xf32, #tpu.memory_space<vmem>>, vector<1x128xf32>
    %27 = vector.broadcast %26 : vector<1x128xf32> to vector<16x128xf32>
    %28 = arith.mulf %25, %27 : vector<16x128xf32>
    %c0_29 = arith.constant 0 : index
    %c0_30 = arith.constant 0 : index
    %29 = vector.load %arg4[%c0_29, %c0_30] : memref<1x128xf32, #tpu.memory_space<vmem>>, vector<1x128xf32>
    %30 = vector.broadcast %29 : vector<1x128xf32> to vector<16x128xf32>
    %31 = arith.addf %28, %30 : vector<16x128xf32>
    %cst_31 = arith.constant 0.000000e+00 : f32
    %32 = vector.broadcast %cst_31 : f32 to vector<16x128xf32>
    %33 = arith.maximumf %31, %32 : vector<16x128xf32>
    %34 = arith.truncf %33 : vector<16x128xf32> to vector<16x128xbf16>
    %c1_32 = arith.constant 1 : index
    %c0_33 = arith.constant 0 : index
    %35 = vector.load %arg9[%c1_32, %c0_33] : memref<18x144xbf16, #tpu.memory_space<vmem>>, vector<16x128xbf16>
    tpu.vector_store %arg9[%c1_32, %c0_33], %34 {strides = array<i32>} : memref<18x144xbf16, #tpu.memory_space<vmem>>, vector<16x128xbf16>,
    %cst_34 = arith.constant 0.000000e+00 : f32
    %36 = vector.broadcast %cst_34 : f32 to vector<16x128xf32>
    %c0_35 = arith.constant 0 : index
    %c0_36 = arith.constant 0 : index
    %37 = vector.load %arg9[%c0_35, %c0_36] : memref<18x144xbf16, #tpu.memory_space<vmem>>, vector<16x144xbf16>
    %c0_37 = arith.constant 0 : index
    %c0_38 = arith.constant 0 : index
    %c0_39 = arith.constant 0 : index
    %38 = vector.load %arg5[%c0_37, %c0_38, %c0_39] : memref<3x144x128xbf16, #tpu.memory_space<vmem>>, vector<1x144x128xbf16>
    %39 = vector.shape_cast %38 : vector<1x144x128xbf16> to vector<144x128xbf16>
    %cst_40 = arith.constant dense<0.000000e+00> : vector<16x128xf32>
    %40 = tpu.matmul %37, %39, %cst_40 {dimension_numbers = #tpu.dot_dimension_numbers<[1], [0], [0], [1], [0, 0, 1, 1], [], []>} : vector<16x144xbf16>, vector<144x128xbf16>, vector<16x128xf32> -> vector<16x128xf32>
    %41 = arith.addf %36, %40 : vector<16x128xf32>
    %c1_41 = arith.constant 1 : index
    %c0_42 = arith.constant 0 : index
    %42 = vector.load %arg9[%c1_41, %c0_42] : memref<18x144xbf16, #tpu.memory_space<vmem>>, vector<16x144xbf16>
    %c1_43 = arith.constant 1 : index
    %c0_44 = arith.constant 0 : index
    %c0_45 = arith.constant 0 : index
    %43 = vector.load %arg5[%c1_43, %c0_44, %c0_45] : memref<3x144x128xbf16, #tpu.memory_space<vmem>>, vector<1x144x128xbf16>
    %44 = vector.shape_cast %43 : vector<1x144x128xbf16> to vector<144x128xbf16>
    %cst_46 = arith.constant dense<0.000000e+00> : vector<16x128xf32>
    %45 = tpu.matmul %42, %44, %cst_46 {dimension_numbers = #tpu.dot_dimension_numbers<[1], [0], [0], [1], [0, 0, 1, 1], [], []>} : vector<16x144xbf16>, vector<144x128xbf16>, vector<16x128xf32> -> vector<16x128xf32>
    %46 = arith.addf %41, %45 : vector<16x128xf32>
    %c2_47 = arith.constant 2 : index
    %c0_48 = arith.constant 0 : index
    %47 = vector.load %arg9[%c2_47, %c0_48] : memref<18x144xbf16, #tpu.memory_space<vmem>>, vector<16x144xbf16>
    %c2_49 = arith.constant 2 : index
    %c0_50 = arith.constant 0 : index
    %c0_51 = arith.constant 0 : index
    %48 = vector.load %arg5[%c2_49, %c0_50, %c0_51] : memref<3x144x128xbf16, #tpu.memory_space<vmem>>, vector<1x144x128xbf16>
    %49 = vector.shape_cast %48 : vector<1x144x128xbf16> to vector<144x128xbf16>
    %cst_52 = arith.constant dense<0.000000e+00> : vector<16x128xf32>
    %50 = tpu.matmul %47, %49, %cst_52 {dimension_numbers = #tpu.dot_dimension_numbers<[1], [0], [0], [1], [0, 0, 1, 1], [], []>} : vector<16x144xbf16>, vector<144x128xbf16>, vector<16x128xf32> -> vector<16x128xf32>
    %51 = arith.addf %46, %50 : vector<16x128xf32>
    %c0_53 = arith.constant 0 : index
    %c0_54 = arith.constant 0 : index
    %52 = vector.load %arg6[%c0_53, %c0_54] : memref<1x128xf32, #tpu.memory_space<vmem>>, vector<1x128xf32>
    %53 = vector.broadcast %52 : vector<1x128xf32> to vector<16x128xf32>
    %54 = arith.mulf %51, %53 : vector<16x128xf32>
    %c0_55 = arith.constant 0 : index
    %c0_56 = arith.constant 0 : index
    %55 = vector.load %arg7[%c0_55, %c0_56] : memref<1x128xf32, #tpu.memory_space<vmem>>, vector<1x128xf32>
    %56 = vector.broadcast %55 : vector<1x128xf32> to vector<16x128xf32>
    %57 = arith.addf %54, %56 : vector<16x128xf32>
    %58 = arith.addf %57, %7 : vector<16x128xf32>
    %cst_57 = arith.constant 0.000000e+00 : f32
    %59 = vector.broadcast %cst_57 : f32 to vector<16x128xf32>
    %60 = arith.maximumf %58, %59 : vector<16x128xf32>
    %c0_58 = arith.constant 0 : index
    %c0_59 = arith.constant 0 : index
    %c0_60 = arith.constant 0 : index
    %61 = vector.load %arg8[%c0_58, %c0_59, %c0_60] : memref<1x16x128xf32, #tpu.memory_space<vmem>>, vector<1x16x128xf32>
    %62 = vector.shape_cast %61 : vector<1x16x128xf32> to vector<16x128xf32>
    %63 = vector.shape_cast %60 : vector<16x128xf32> to vector<1x16x128xf32>
    tpu.vector_store %arg8[%c0_58, %c0_59, %c0_60], %63 {strides = array<i32>} : memref<1x16x128xf32, #tpu.memory_space<vmem>>, vector<1x16x128xf32>,
    return
  }
  func.func @transform_0(%arg0: i32) -> (i32, i32, i32) {
    %c0_i32 = arith.constant 0 : i32
    %c0_i32_0 = arith.constant 0 : i32
    %c0_i32_1 = arith.constant 0 : i32
    return %arg0, %c0_i32, %c0_i32_0 : i32, i32, i32
  }
  func.func @transform_1(%arg0: i32) -> (i32, i32, i32) {
    %c0_i32 = arith.constant 0 : i32
    %c0_i32_0 = arith.constant 0 : i32
    %c0_i32_1 = arith.constant 0 : i32
    %c0_i32_2 = arith.constant 0 : i32
    return %c0_i32, %c0_i32_0, %c0_i32_1 : i32, i32, i32
  }
  func.func @transform_2(%arg0: i32) -> (i32, i32) {
    %c0_i32 = arith.constant 0 : i32
    %c0_i32_0 = arith.constant 0 : i32
    %c0_i32_1 = arith.constant 0 : i32
    return %c0_i32, %c0_i32_0 : i32, i32
  }
  func.func @transform_3(%arg0: i32) -> (i32, i32) {
    %c0_i32 = arith.constant 0 : i32
    %c0_i32_0 = arith.constant 0 : i32
    %c0_i32_1 = arith.constant 0 : i32
    return %c0_i32, %c0_i32_0 : i32, i32
  }
  func.func @transform_4(%arg0: i32) -> (i32, i32, i32) {
    %c0_i32 = arith.constant 0 : i32
    %c0_i32_0 = arith.constant 0 : i32
    %c0_i32_1 = arith.constant 0 : i32
    %c0_i32_2 = arith.constant 0 : i32
    return %c0_i32, %c0_i32_0, %c0_i32_1 : i32, i32, i32
  }
  func.func @transform_5(%arg0: i32) -> (i32, i32) {
    %c0_i32 = arith.constant 0 : i32
    %c0_i32_0 = arith.constant 0 : i32
    %c0_i32_1 = arith.constant 0 : i32
    return %c0_i32, %c0_i32_0 : i32, i32
  }
  func.func @transform_6(%arg0: i32) -> (i32, i32) {
    %c0_i32 = arith.constant 0 : i32
    %c0_i32_0 = arith.constant 0 : i32
    %c0_i32_1 = arith.constant 0 : i32
    return %c0_i32, %c0_i32_0 : i32, i32
  }
  func.func @transform_7(%arg0: i32) -> (i32, i32, i32) {
    %c0_i32 = arith.constant 0 : i32
    %c0_i32_0 = arith.constant 0 : i32
    %c0_i32_1 = arith.constant 0 : i32
    return %arg0, %c0_i32, %c0_i32_0 : i32, i32, i32
  }
}

</mosaic_0001>

<bundles_post_ra>
// kernel: tile.23
= control target key start
LH: loop header
LB: loop body
LE: loop exit
PB: predicated region body
PF: predicated region fallthrough
CT: control target
= control target key end

     0   :  { %s28_s0 = inlined_call_operand.vmem [shape: f32[8], index: 0, kind: input, shape index: {}]   ;;  %s29_s1 = inlined_call_operand.vmem [shape: f32[16,8], index: 1, kind: output, shape index: {}]  }
   0x1   :  { %v4_v0 = vld [vmem:[%s28_s0] ss:$0 sm:$0xff] }
   0x2   :  { %5 = vst [vmem:[%s29_s1] sm:$0xff] %v4_v0  ;;  %8 = vst [vmem:[%s29_s1 + $0x8] sm:$0xff] %v4_v0 }

// kernel: tile.24
= control target key start
LH: loop header
LB: loop body
LE: loop exit
PB: predicated region body
PF: predicated region fallthrough
CT: control target
= control target key end

     0   :  { %s131_s10 = smov 120   ;;  %s132_s11 = smov 104   ;;  %vm3_vm0 = vcmask 64512   ;;  %vm9_vm1 = vcmask 1048512   ;;  %vm15_vm2 = vcmask 982912   ;;  %vm21_vm3 = vcmask 917312   ;;  %s207_s0 = inlined_call_operand.vmem [shape: f32[16,8], index: 0, kind: input, shape index: {}]   ;;  %s208_s1 = inlined_call_operand.vmem [shape: f32[1,128], index: 1, kind: output, shape index: {}]  }
   0x1   :  { %v101_v0 = vld [vmem:[%s207_s0 + $0xf] sm:$0x1]   ;;  %v103_v1 = vld [vmem:[%s207_s0 + $0xd] sm:$0x1]   ;;  %v102_v2 = vld [vmem:[%s207_s0 + $0xe] sm:$0x1]  }
   0x2   :  { %7 = vrot.lane.b32.xlu0 %v101_v0, %s131_s10  ;;  %19 = vrot.lane.b32.xlu1 %v103_v1, %s132_s11  ;;  %v104_v3 = vld [vmem:[%s207_s0 + $0xc] sm:$0x1]   ;;  %s133_s16 = smov 112   ;;  %s134_s17 = smov 96   ;;  %v105_v4 = vld [vmem:[%s207_s0 + $0xb] sm:$0x1]  }
   0x3   :  { %v106_v5 = vld [vmem:[%s207_s0 + $0xa] sm:$0x1]   ;;  %v2_v6 = vld [vmem:[%s207_s0] sm:$0x1]   ;;  %s135_s24 = smov 88   ;;  %s136_s25 = smov 80  }
   0x4   :  { %4 = vst.msk [vmem:[#allocation0] sm:$0x1] %vm3_vm0, %v2_v6   ;;  %v107_v7 = vld [vmem:[%s207_s0 + $0x9] sm:$0x1]   ;;  %v108_v8 = vld [vmem:[%s207_s0 + $0x8] sm:$0x1]  }
   0x5   :  { %s137_s30 = smov 72   ;;  %s138_s2 = smov 64   ;;  %v109_v9 = vld [vmem:[%s207_s0 + $0x7] sm:$0x1]   ;;  %v110_v10 = vld [vmem:[%s207_s0 + $0x6] sm:$0x1]  }
   0x6   :  { %13 = vrot.lane.b32.xlu0 %v102_v2, %s133_s16  ;;  %25 = vrot.lane.b32.xlu1 %v104_v3, %s134_s17  ;;  %s139_s7 = smov 56   ;;  %s140_s8 = smov 48   ;;  %v111_v11 = vld [vmem:[%s207_s0 + $0x5] sm:$0x1]   ;;  %v112_v12 = vld [vmem:[%s207_s0 + $0x4] sm:$0x1]  }
   0x7   :  { %s141_s13 = smov 40   ;;  %s142_s14 = smov 32   ;;  %v113_v13 = vld [vmem:[%s207_s0 + $0x3] sm:$0x1]   ;;  %v114_v14 = vld [vmem:[%s207_s0 + $0x2] sm:$0x1]  }
   0x8   :  { %s143_s19 = smov 24   ;;  %s144_s20 = smov 16   ;;  %v115_v15 = vld [vmem:[%s207_s0 + $0x1] sm:$0x1]   ;;  %vm27_vm4 = vcmask 851712   ;;  %vm33_vm5 = vcmask 786112  }
   0x9   :  { %s145_s0 = smov 8   ;;  %vm39_vm6 = vcmask 720512   ;;  %vm45_vm7 = vcmask 654912   ;;  %vm51_vm8 = vcmask 589312   ;;  %vm57_vm9 = vcmask 523712  }
   0xa   :  { %31 = vrot.lane.b32.xlu0 %v105_v4, %s135_s24  ;;  %37 = vrot.lane.b32.xlu1 %v106_v5, %s136_s25  ;;  %vm63_vm10 = vcmask 458112   ;;  %vm69_vm11 = vcmask 392512   ;;  %vm75_vm12 = vcmask 326912   ;;  %vm81_vm13 = vcmask 261312  }
   0xb   :  { %vm87_vm14 = vcmask 195712   ;;  %vm93_vm15 = vcmask 130112  }
   0xe   :  { %43 = vrot.lane.b32.xlu0 %v107_v7, %s137_s30  ;;  %49 = vrot.lane.b32.xlu1 %v108_v8, %s138_s2 }
  0x12   :  { %55 = vrot.lane.b32.xlu0 %v109_v9, %s139_s7  ;;  %61 = vrot.lane.b32.xlu1 %v110_v10, %s140_s8 }
  0x16   :  { %67 = vrot.lane.b32.xlu0 %v111_v11, %s141_s13  ;;  %73 = vrot.lane.b32.xlu1 %v112_v12, %s142_s14 }
  0x1a   :  { %79 = vrot.lane.b32.xlu0 %v113_v13, %s143_s19  ;;  %85 = vrot.lane.b32.xlu1 %v114_v14, %s144_s20 }
  0x1e   :  { %91 = vrot.lane.b32.xlu0 %v115_v15, %s145_s0 }
  0x74   :  { %v8_v16 = vpop.permute.xlu0 %7   ;;  %v20_v17 = vpop.permute.xlu1 %19  }
  0x75   :  { %10 = vst.msk [vmem:[#allocation0] sm:$0x1] %vm9_vm1, %v8_v16  }
  0x78   :  { %v14_v18 = vpop.permute.xlu0 %13   ;;  %v26_v19 = vpop.permute.xlu1 %25  }
  0x79   :  { %16 = vst.msk [vmem:[#allocation0] sm:$0x1] %vm15_vm2, %v14_v18  }
  0x7a   :  { %22 = vst.msk [vmem:[#allocation0] sm:$0x1] %vm21_vm3, %v20_v17  }
  0x7b   :  { %28 = vst.msk [vmem:[#allocation0] sm:$0x1] %vm27_vm4, %v26_v19  }
  0x7c   :  { %v32_v20 = vpop.permute.xlu0 %31   ;;  %v38_v21 = vpop.permute.xlu1 %37  }
  0x7d   :  { %34 = vst.msk [vmem:[#allocation0] sm:$0x1] %vm33_vm5, %v32_v20  }
  0x7e   :  { %40 = vst.msk [vmem:[#allocation0] sm:$0x1] %vm39_vm6, %v38_v21  }
  0x80   :  { %v44_v22 = vpop.permute.xlu0 %43   ;;  %v50_v23 = vpop.permute.xlu1 %49  }
  0x81   :  { %46 = vst.msk [vmem:[#allocation0] sm:$0x1] %vm45_vm7, %v44_v22  }
  0x82   :  { %52 = vst.msk [vmem:[#allocation0] sm:$0x1] %vm51_vm8, %v50_v23  }
  0x84   :  { %v56_v24 = vpop.permute.xlu0 %55   ;;  %v62_v25 = vpop.permute.xlu1 %61  }
  0x85   :  { %58 = vst.msk [vmem:[#allocation0] sm:$0x1] %vm57_vm9, %v56_v24  }
  0x86   :  { %64 = vst.msk [vmem:[#allocation0] sm:$0x1] %vm63_vm10, %v62_v25  }
  0x88   :  { %v68_v26 = vpop.permute.xlu0 %67   ;;  %v74_v27 = vpop.permute.xlu1 %73  }
  0x89   :  { %70 = vst.msk [vmem:[#allocation0] sm:$0x1] %vm69_vm11, %v68_v26  }
  0x8a   :  { %76 = vst.msk [vmem:[#allocation0] sm:$0x1] %vm75_vm12, %v74_v27  }
  0x8c   :  { %v80_v28 = vpop.permute.xlu0 %79   ;;  %v86_v29 = vpop.permute.xlu1 %85  }
  0x8d   :  { %82 = vst.msk [vmem:[#allocation0] sm:$0x1] %vm81_vm13, %v80_v28  }
  0x8e   :  { %88 = vst.msk [vmem:[#allocation0] sm:$0x1] %vm87_vm14, %v86_v29  }
  0x90   :  { %v92_v30 = vpop.permute.xlu0 %91  }
  0x91   :  { %94 = vst.msk [vmem:[#allocation0] sm:$0x1] %vm93_vm15, %v92_v30  }
  0x98   :  { %v98_v31 = vld [vmem:[#allocation0] sm:$0x1] }
  0x99   :  { %100 = vst [vmem:[%s208_s1] sm:$0x1] %v98_v31 }

// kernel: basic_block_forward.1
= control target key start
LH: loop header
LB: loop body
LE: loop exit
PB: predicated region body
PF: predicated region fallthrough
CT: control target
= control target key end

     0   :  { %s1598_s24 = smov 0   ;;  %s1927_s0 = inlined_call_operand.vmem [shape: f32[2,16,128], index: 0, kind: input, shape index: {}]   ;;  %s1928_s1 = inlined_call_operand.vmem [shape: bf16[3,144,128], index: 1, kind: input, shape index: {}]   ;;  %s1929_s2 = inlined_call_operand.vmem [shape: f32[1,128], index: 2, kind: input, shape index: {}]   ;;  %s1930_s3 = inlined_call_operand.vmem [shape: f32[1,128], index: 3, kind: input, shape index: {}]   ;;  %s1931_s4 = inlined_call_operand.vmem [shape: bf16[3,144,128], index: 4, kind: input, shape index: {}]   ;;  %s1932_s5 = inlined_call_operand.vmem [shape: f32[1,128], index: 5, kind: input, shape index: {}]   ;;  %s1933_s6 = inlined_call_operand.vmem [shape: f32[1,128], index: 6, kind: input, shape index: {}]   ;;  %s1934_s7 = inlined_call_operand.vmem [shape: f32[2,16,128], index: 7, kind: output, shape index: {}]  }
   0x1 LB: > { %s1289_s25 = sadd.s32 4294967295, %s1555_s24   ;;  %p1293_p0 = scmp.ge.s32.totalorder %s1555_s24, 1  ;;  %s1555_s24 = sphi %s1598_s24, %s17_s24  }
   0x2   : > { %p237_p1 = scmp.lt.s32.totalorder %s1555_s24, 3 }
   0x4   : > { %p238_p2 = pnand %p1293_p0, %p237_p1 }
   0x5   : > { %v1483_v0 = vld [vmem:[%s1928_s1 + $0x48] sm:$0xff] (!%p238_p2)   ;;  %v1557_v1 = vmov (!%p238_p2), 0   ;;  %p269_p3 = scmp.lt.s32.totalorder (!%p238_p2), %s1289_s25, 1  ;;  %v1484_v2 = vld [vmem:[%s1928_s1 + $0x50] sm:$0xff] (!%p238_p2)   ;;  %v1485_v3 = vld [vmem:[%s1928_s1 + $0x58] sm:$0xff] (!%p238_p2)   ;;  %vm298_vm0 = vcmask (!%p238_p2), 125952  }
   0x6   : > { %241 = sbr.rel (%p238_p2) target bundleno = 658 (0x292), region = 48  ;;  %479 = vmatprep.subr.bf16.mxu0 (!%p238_p2), %v1557_v1  ;;  %939 = vmatprep.subr.bf16.mxu1 (!%p238_p2), %v1557_v1  ;;  %vm280_vm1 = vcmask (!%p238_p2), 1040384   ;;  %300 = vst.msk [vmem:[#allocation2 + $0xc] sm:$0xf] (!%p238_p2), %vm298_vm0, %v1557_v1  ;;  %vm283_vm2 = vcmask (!%p238_p2), 126980   ;;  %v1486_v4 = vld [vmem:[%s1928_s1 + $0x60] sm:$0xff] (!%p238_p2)  }
   0x7   : > { %480 = vmatpush1.bf16.msra.mxu0 (!%p238_p2), %v1483_v0  ;;  %vm281_vm3 = vsmask.f32 (!%p238_p2), 256  ;;  %vm284_vm4 = vsmask.f32 (!%p238_p2), 4352  ;;  %v287_v6 = vld [vmem:[#allocation2] sm:$0x11] (!%p238_p2) }
   0x8   : > { %481 = vmatprep.subr.bf16.mxu0 (!%p238_p2), %v1557_v1  ;;  %vm1634_vm5 = vmand (!%p238_p2), %vm280_vm1, %vm281_vm3  ;;  %vm290_vm6 = vsmask.f32 (!%p238_p2), 7938  ;;  %vm292_vm8 = vsmask.f32 (!%p238_p2), 7954  ;;  %v295_v7 = vld [vmem:[#allocation2 + $0x10] sm:$0x11] (!%p238_p2) }
   0x9   : > { %vm285_vm7 = vmand (!%p238_p2), %vm283_vm2, %vm284_vm4  ;;  %v1487_v12 = vld [vmem:[%s1928_s1 + $0x68] sm:$0xff] (!%p238_p2)   ;;  %vm311_vm11 = vsmask.f32 (!%p238_p2), 4368  ;;  %vm301_vm14 = vcmask (!%p238_p2), 122880   ;;  %vm333_vm15 = vcmask (!%p238_p2), 1043456   ;;  %v1488_v22 = vld [vmem:[%s1928_s1 + $0x70] sm:$0xff] (!%p238_p2)  }
   0xa   : > { %vm286_vm9 = vmor (!%p238_p2), %vm285_vm7, %vm1634_vm5  ;;  %v1489_v30 = vld [vmem:[%s1928_s1 + $0x78] sm:$0xff] (!%p238_p2)   ;;  %v1490_v34 = vld [vmem:[%s1928_s1 + $0x80] sm:$0xff] (!%p238_p2)   ;;  %vm643_vm4 = vcmask (!%p238_p2), 1046528  }
   0xb   : > { %482 = vmatpush1.bf16.msra.mxu0 (!%p238_p2), %v1484_v2  ;;  %v288_v13 = vsel (!%p238_p2), %vm286_vm9, 0, %v287_v6  ;;  %vm291_vm10 = vmand (!%p238_p2), %vm280_vm1, %vm290_vm6  ;;  %v1491_v36 = vld [vmem:[%s1928_s1 + $0x88] sm:$0xff] (!%p238_p2)   ;;  %v1496_v53 = vld [vmem:[%s1928_s1] sm:$0xff] (!%p238_p2)  }
   0xc   : > { %483 = vmatprep.subr.bf16.mxu0 (!%p238_p2), %v1557_v1  ;;  %289 = vst [vmem:[#allocation2] sm:$0x11] (!%p238_p2), %v288_v13  ;;  %vm293_vm12 = vmand (!%p238_p2), %vm283_vm2, %vm292_vm8  ;;  %vm395_vm2 = vsmask.f32 (!%p238_p2), 7424  ;;  %v1497_v58 = vld [vmem:[%s1928_s1 + $0x8] sm:$0xff] (!%p238_p2)   ;;  %v1498_v59 = vld [vmem:[%s1928_s1 + $0x10] sm:$0xff] (!%p238_p2)  }
   0xd   : > { %s1942_s25 = smov (!%p269_p3, %s1289_s25), 1  ;;  %vm294_vm13 = vmor %vm293_vm12, %vm291_vm10  ;;  %299 = vst.msk [vmem:[#allocation2 + $0x4] sm:$0xf] %vm298_vm0, %v1557_v1  ;;  %v1499_v60 = vld [vmem:[%s1928_s1 + $0x18] sm:$0xff]   ;;  %v1500_v61 = vld [vmem:[%s1928_s1 + $0x20] sm:$0xff]  }
   0xe   : > { %s1452_s30 = sshll.u32 %s1942_s25, 4  ;;  %v296_v18 = vsel %vm294_vm13, 0, %v295_v7  ;;  %vm1661_vm1 = vmor %vm281_vm3, %vm311_vm11  ;;  %vm475_vm3 = vcmask 130048   ;;  %v1501_v62 = vld [vmem:[%s1928_s1 + $0x28] sm:$0xff]   ;;  %v1502_v63 = vld [vmem:[%s1928_s1 + $0x30] sm:$0xff]  }
   0xf   : > { %s273_s12 = scalar_lea.vmem %s1927_s0, %s1452_s30  ;;  %484 = vmatpush1.bf16.msra.mxu0 %v1485_v3  ;;  %297 = vst [vmem:[#allocation2 + $0x10] sm:$0x11] %v296_v18  ;;  %vm1670_vm0 = vmand %vm333_vm15, %vm290_vm6  ;;  %v1503_v2 = vld [vmem:[%s1928_s1 + $0x38] sm:$0xff]   ;;  %v1507_v13 = vld [vmem:[%s1928_s1 + $0xa0] sm:$0xff]   ;;  %s278_s27 = scalar_lea.vmem %s1934_s7, %s1452_s30 }
  0x10   : > { %485 = vmatprep.subr.bf16.mxu0 %v1557_v1  ;;  %v1640_v8 = vld [vmem:[%s273_s12] sm:$0xff]  ;;  %v1642_v9 = vld [vmem:[%s273_s12 + $0x8] sm:$0xff]  ;;  %302 = vst.msk [vmem:[#allocation2 + $0x14] sm:$0x1] %vm301_vm14, %v1557_v1 }
  0x11   : > { %v1454_v10 = vpack.c.bf16 %v1640_v8, %v1640_v8  ;;  %v1455_v11 = vpack.c.bf16 %v1642_v9, %v1642_v9  ;;  %v1512_v18 = vld [vmem:[%s1928_s1 + $0xc8] sm:$0xff]  }
  0x13   : > { %486 = vmatpush1.bf16.msra.mxu0 %v1486_v4  ;;  %v314_v14 = vshrl.u32 %v1454_v10, 16  ;;  %v317_v15 = vshll.u32 %v1454_v10, 16  ;;  %v322_v16 = vshrl.u32 %v1455_v11, 16  ;;  %v325_v17 = vshll.u32 %v1455_v11, 16  ;;  %v335_v29 = vld [vmem:[#allocation2] sm:$0xf] }
  0x14   : > { %487 = vmatprep.subr.bf16.mxu0 %v1557_v1  ;;  %v1504_v4 = vld [vmem:[%s1928_s1 + $0x40] sm:$0xff]   ;;  %v1505_v10 = vld [vmem:[%s1928_s1 + $0x90] sm:$0xff]  }
  0x15   : > { %v316_v19 = vrot.slane %v314_v14, 7  ;;  %v324_v20 = vrot.slane %v322_v16, 7  ;;  %v1508_v14 = vld [vmem:[%s1928_s1 + $0xa8] sm:$0xff]   ;;  %v1510_v16 = vld [vmem:[%s1928_s1 + $0xb8] sm:$0xff]  }
  0x16   : > { %v339_v32 = vld [vmem:[#allocation2 + $0x10] sm:$0x1] }
  0x17   : > { %488 = vmatpush1.bf16.msra.mxu0 %v1487_v12  ;;  %v319_v23 = vor.u32 %v317_v15, %v316_v19  ;;  %v320_v24 = vrot.slane %v316_v19, 4  ;;  %v327_v25 = vor.u32 %v325_v17, %v324_v20  ;;  %v329_v28 = vrot.slane %v324_v20, 4  ;;  %v1506_v12 = vld [vmem:[%s1928_s1 + $0x98] sm:$0xff]   ;;  %v1509_v15 = vld [vmem:[%s1928_s1 + $0xb0] sm:$0xff]   ;;  %v1511_v17 = vld [vmem:[%s1928_s1 + $0xc0] sm:$0xff]  }
  0x18   : > { %489 = vmatprep.subr.bf16.mxu0 %v1557_v1  ;;  %v1513_v20 = vld [vmem:[%s1928_s1 + $0xd0] sm:$0xff]  }
  0x19   : > { %v328_v27 = vsel %vm1661_vm1, %v320_v24, %v327_v25  ;;  %v336_v31 = vsel %vm1670_vm0, %v319_v23, %v335_v29  ;;  %v340_v33 = vsel %vm1634_vm5, %v329_v28, %v339_v32  ;;  %v1516_v25 = vld [vmem:[%s1931_s4 + $0x48] sm:$0xff]   ;;  %v1518_v28 = vld [vmem:[%s1931_s4 + $0x58] sm:$0xff]   ;;  %v1519_v29 = vld [vmem:[%s1931_s4 + $0x60] sm:$0xff]  }
  0x1a   : > { %338 = vst [vmem:[#allocation2 + $0x8] sm:$0xf] %v328_v27  ;;  %337 = vst [vmem:[#allocation2] sm:$0xf] %v336_v31  ;;  %940 = vmatpush1.bf16.msra.mxu1 %v1516_v25  ;;  %v1517_v27 = vld [vmem:[%s1931_s4 + $0x50] sm:$0xff]   ;;  %v1522_v32 = vld [vmem:[%s1931_s4 + $0x78] sm:$0xff]  }
  0x1b   : > { %490 = vmatpush1.bf16.msra.mxu0 %v1488_v22  ;;  %341 = vst [vmem:[#allocation2 + $0x10] sm:$0x1] %v340_v33  ;;  %941 = vmatprep.subr.bf16.mxu1 %v1557_v1  ;;  %v1521_v31 = vld [vmem:[%s1931_s4 + $0x70] sm:$0xff]   ;;  %v1523_v33 = vld [vmem:[%s1931_s4 + $0x80] sm:$0xff]  }
  0x1c   : > { %491 = vmatprep.subr.bf16.mxu0 %v1557_v1 }
  0x1e   : > { %942 = vmatpush1.bf16.msra.mxu1 %v1517_v27  ;;  %v1529_v27 = vld [vmem:[%s1931_s4] sm:$0xff]  }
  0x1f   : > { %492 = vmatpush1.bf16.msra.mxu0 %v1489_v30  ;;  %943 = vmatprep.subr.bf16.mxu1 %v1557_v1  ;;  %v1520_v30 = vld [vmem:[%s1931_s4 + $0x68] sm:$0xff]  }
  0x20   : > { %493 = vmatprep.subr.bf16.mxu0 %v1557_v1 }
  0x21   : > { %v1689_v35 = vld [vmem:[#allocation2 + $0x8] sm:$0xff]  ;;  %v342_v37 = vld [vmem:[#allocation2] sm:$0xff] }
  0x22   : > { %v1319_v38 = vcombine.high %v342_v37, %v1689_v35  ;;  %v1318_v39 = vcombine.low %v342_v37, %v1689_v35  ;;  %v362_v40 = vld [vmem:[#allocation2 + $0x10] sm:$0x11]  ;;  %v618_v0 = vld [vmem:[#allocation2] sm:$0xee]  ;;  %944 = vmatpush1.bf16.msra.mxu1 %v1518_v28  ;;  %v1373_v37 = vld [vmem:[%s1930_s3] ss:$0 sm:$0xff] }
  0x23   : > { %494 = vmatpush1.bf16.msra.mxu0 %v1490_v34  ;;  %v1321_v45 = vcombine.high %v362_v40, %v362_v40  ;;  %v1697_v46 = vcombine.low %v362_v40, %v362_v40  ;;  %v1361_v3 = vcombine.high %v618_v0, %v1689_v35  ;;  %v1360_v19 = vcombine.low %v618_v0, %v1689_v35  ;;  %v1524_v34 = vld [vmem:[%s1931_s4 + $0x88] sm:$0xff]   ;;  %v1372_v35 = vld [vmem:[%s1929_s2] ss:$0 sm:$0xff] }
  0x24   : > { %495 = vmatprep.subr.bf16.mxu0 %v1557_v1  ;;  %v409_v41 = vshrl.u32 %v1319_v38, 16  ;;  %v411_v42 = vshll.u32 %v1319_v38, 16  ;;  %v397_v43 = vshrl.u32 %v1318_v39, 16  ;;  %v399_v44 = vshll.u32 %v1318_v39, 16  ;;  %945 = vmatprep.subr.bf16.mxu1 %v1557_v1 }
  0x25   : > { %v416_v49 = vshll.u32 %v1321_v45, 16  ;;  %v404_v50 = vshll.u32 %v1697_v46, 16  ;;  %v647_v6 = vrot.slane %v1361_v3, 1  ;;  %v648_v7 = vrot.slane %v1321_v45, 1 }
  0x26   : > { %v413_v47 = vrot.slane %v411_v42, 1  ;;  %v401_v48 = vrot.slane %v399_v44, 1  ;;  %v644_v22 = vrot.slane %v1360_v19, 1  ;;  %v645_v23 = vrot.slane %v1697_v46, 1  ;;  %946 = vmatpush1.bf16.msra.mxu1 %v1519_v29 }
  0x27   : > { %496 = vmatpush1.bf16.msra.mxu0 %v1491_v36  ;;  %v418_v54 = vrot.slane %v416_v49, 1  ;;  %v406_v55 = vrot.slane %v404_v50, 1  ;;  %v649_v11 = vsel %vm643_vm4, %v647_v6, %v648_v7  ;;  %947 = vmatprep.subr.bf16.mxu1 %v1557_v1 }
  0x28   : > { %577 = vmatprep.subr.bf16.mxu0 %v1557_v1  ;;  %v414_v51 = vor.u32 %v413_v47, %v409_v41  ;;  %v402_v52 = vor.u32 %v401_v48, %v397_v43  ;;  %v646_v24 = vsel %vm643_vm4, %v644_v22, %v645_v23 }
  0x2a   : > { %v419_v56 = vsel %vm395_vm2, %v414_v51, %v418_v54  ;;  %v407_v57 = vsel %vm395_vm2, %v402_v52, %v406_v55  ;;  %948 = vmatpush1.bf16.msra.mxu1 %v1520_v30  ;;  %v1530_v30 = vld [vmem:[%s1931_s4 + $0x8] sm:$0xff]  }
  0x2b   : > { %1331 = vmatprep.mubr.msk.bf16.mxu0 %vm475_vm3, %v419_v56  ;;  %949 = vmatprep.subr.bf16.mxu1 %v1557_v1 }
  0x2c   : > { %512 = vmatmul.mubr.bf16.vlgmr.msra.gmra.mrb[0].mxu0 %v407_v57  ;;  %v801_v57 = vld [vmem:[#allocation2 + $0x10] sm:$0x1] }
  0x2d   : > { %578 = vmatpush1.bf16.msra.mxu0 %v1496_v53  ;;  %1341 = vmatprep.mubr.msk.bf16.mxu0 %vm475_vm3, %v1319_v38  ;;  %v797_v53 = vld [vmem:[#allocation2] sm:$0xf] }
  0x2e   : > { %579 = vmatprep.subr.bf16.mxu0 %v1557_v1  ;;  %950 = vmatpush1.bf16.msra.mxu1 %v1521_v31  ;;  %v1531_v31 = vld [vmem:[%s1931_s4 + $0x10] sm:$0xff]  }
  0x2f   : > { %951 = vmatprep.subr.bf16.mxu1 %v1557_v1 }
  0x31   : > { %580 = vmatpush1.bf16.msra.mxu0 %v1497_v58 }
  0x32   : > { %581 = vmatprep.subr.bf16.mxu0 %v1557_v1  ;;  %952 = vmatpush1.bf16.msra.mxu1 %v1522_v32  ;;  %v1532_v32 = vld [vmem:[%s1931_s4 + $0x18] sm:$0xff]  }
  0x33   : > { %953 = vmatprep.subr.bf16.mxu1 %v1557_v1 }
  0x35   : > { %582 = vmatpush1.bf16.msra.mxu0 %v1498_v59 }
  0x36   : > { %583 = vmatprep.subr.bf16.mxu0 %v1557_v1  ;;  %954 = vmatpush1.bf16.msra.mxu1 %v1523_v33  ;;  %v1533_v33 = vld [vmem:[%s1931_s4 + $0x20] sm:$0xff]  }
  0x37   : > { %955 = vmatprep.subr.bf16.mxu1 %v1557_v1 }
  0x39   : > { %584 = vmatpush1.bf16.msra.mxu0 %v1499_v60 }
  0x3a   : > { %585 = vmatprep.subr.bf16.mxu0 %v1557_v1  ;;  %956 = vmatpush1.bf16.msra.mxu1 %v1524_v34  ;;  %v1534_v34 = vld [vmem:[%s1931_s4 + $0x28] sm:$0xff]  }
  0x3b   : > { %1037 = vmatprep.subr.bf16.mxu1 %v1557_v1 }
  0x3d   : > { %586 = vmatpush1.bf16.msra.mxu0 %v1500_v61 }
  0x3e   : > { %587 = vmatprep.subr.bf16.mxu0 %v1557_v1 }
  0x41   : > { %588 = vmatpush1.bf16.msra.mxu0 %v1501_v62 }
  0x42   : > { %589 = vmatprep.subr.bf16.mxu0 %v1557_v1 }
  0x45   : > { %590 = vmatpush1.bf16.msra.mxu0 %v1502_v63 }
  0x46   : > { %591 = vmatprep.subr.bf16.mxu0 %v1557_v1 }
  0x49   : > { %592 = vmatpush1.bf16.msra.mxu0 %v1503_v2 }
  0x4a   : > { %593 = vmatprep.subr.bf16.mxu0 %v1557_v1 }
  0x4d   : > { %594 = vmatpush1.bf16.msra.mxu0 %v1504_v4 }
  0x4e   : > { %708 = vmatprep.subr.bf16.mxu0 %v1557_v1 }
  0x50   : > { %610 = vmatmul.mubr.bf16.vlgmr.msra.gmra.mrb[0].mxu0 %v1318_v39 }
  0x51   : > { %709 = vmatpush1.bf16.msra.mxu0 %v1505_v10  ;;  %1371 = vmatprep.mubr.msk.bf16.mxu0 %vm475_vm3, %v649_v11 }
  0x52   : > { %710 = vmatprep.subr.bf16.mxu0 %v1557_v1 }
  0x55   : > { %711 = vmatpush1.bf16.msra.mxu0 %v1506_v12 }
  0x56   : > { %712 = vmatprep.subr.bf16.mxu0 %v1557_v1 }
  0x59   : > { %713 = vmatpush1.bf16.msra.mxu0 %v1507_v13 }
  0x5a   : > { %714 = vmatprep.subr.bf16.mxu0 %v1557_v1 }
  0x5d   : > { %715 = vmatpush1.bf16.msra.mxu0 %v1508_v14 }
  0x5e   : > { %716 = vmatprep.subr.bf16.mxu0 %v1557_v1 }
  0x61   : > { %717 = vmatpush1.bf16.msra.mxu0 %v1509_v15 }
  0x62   : > { %718 = vmatprep.subr.bf16.mxu0 %v1557_v1 }
  0x65   : > { %719 = vmatpush1.bf16.msra.mxu0 %v1510_v16 }
  0x66   : > { %720 = vmatprep.subr.bf16.mxu0 %v1557_v1 }
  0x69   : > { %721 = vmatpush1.bf16.msra.mxu0 %v1511_v17 }
  0x6a   : > { %722 = vmatprep.subr.bf16.mxu0 %v1557_v1 }
  0x6d   : > { %723 = vmatpush1.bf16.msra.mxu0 %v1512_v18 }
  0x6e   : > { %724 = vmatprep.subr.bf16.mxu0 %v1557_v1 }
  0x71   : > { %725 = vmatpush1.bf16.msra.mxu0 %v1513_v20 }
  0x74   : > { %741 = vmatmul.mubr.bf16.vlgmr.msra.gmra.mrb[0].mxu0 %v646_v24 }
 0x147   : > { %v742_v36 = vpop.f32.mrb[0].mxu0 }
 0x148   : > { %v758_v38 = vmul.f32 %v1372_v35, %v742_v36  ;;  %v744_v39 = vpop.f32.mrb[1].mxu0  ;;  %v1536_v36 = vld [vmem:[%s1931_s4 + $0x38] sm:$0xff]  }
 0x149   : > { %v745_v40 = vpop.f32.mrb[2].mxu0 }
 0x14a   : > { %v767_v41 = vadd.f32 %v1373_v37, %v758_v38  ;;  %v759_v42 = vmul.f32 %v1372_v35, %v745_v40  ;;  %v747_v43 = vpop.f32.mrb[3].mxu0  ;;  %v1535_v35 = vld [vmem:[%s1931_s4 + $0x30] sm:$0xff]   ;;  %v1537_v38 = vld [vmem:[%s1931_s4 + $0x40] sm:$0xff]  }
 0x14b   : > { %v1540_v43 = vld [vmem:[%s1931_s4 + $0x98] sm:$0xff]  }
 0x14c   : > { %v769_v44 = vmax.f32 %v767_v41, 0.0  ;;  %v768_v45 = vadd.f32 %v1373_v37, %v759_v42  ;;  %v1538_v41 = vld [vmem:[%s1931_s4 + $0x90] sm:$0xff]  }
 0x14e   : > { %v1456_v46 = vpack.c.bf16 %v769_v44, %v769_v44  ;;  %v770_v47 = vmax.f32 %v768_v45, 0.0  ;;  %v1541_v44 = vld [vmem:[%s1931_s4 + $0xa0] sm:$0xff]   ;;  %v1542_v45 = vld [vmem:[%s1931_s4 + $0xa8] sm:$0xff]  }
 0x150   : > { %v778_v48 = vshrl.u32 %v1456_v46, 16  ;;  %v1457_v49 = vpack.c.bf16 %v770_v47, %v770_v47  ;;  %v781_v51 = vshll.u32 %v1456_v46, 16  ;;  %v1543_v46 = vld [vmem:[%s1931_s4 + $0xb0] sm:$0xff]   ;;  %v1544_v47 = vld [vmem:[%s1931_s4 + $0xb8] sm:$0xff]  }
 0x152   : > { %v780_v50 = vrot.slane %v778_v48, 7  ;;  %v786_v52 = vshrl.u32 %v1457_v49, 16  ;;  %v789_v56 = vshll.u32 %v1457_v49, 16  ;;  %v1545_v48 = vld [vmem:[%s1931_s4 + $0xc0] sm:$0xff]   ;;  %v1546_v49 = vld [vmem:[%s1931_s4 + $0xc8] sm:$0xff]  }
 0x154   : > { %v783_v54 = vor.u32 %v781_v51, %v780_v50  ;;  %v788_v55 = vrot.slane %v786_v52, 7  ;;  %v784_v58 = vrot.slane %v780_v50, 4  ;;  %v1547_v50 = vld [vmem:[%s1931_s4 + $0xd0] sm:$0xff]   ;;  %v1448_v51 = vld [vmem:[%s1932_s5] ss:$0 sm:$0xff] }
 0x156   : > { %v798_v59 = vsel %vm1670_vm0, %v783_v54, %v797_v53  ;;  %v791_v60 = vor.u32 %v789_v56, %v788_v55  ;;  %v793_v61 = vrot.slane %v788_v55, 4  ;;  %v1449_v53 = vld [vmem:[%s1933_s6] ss:$0 sm:$0xff] }
 0x157   : > { %799 = vst [vmem:[#allocation2] sm:$0xf] %v798_v59 }
 0x158   : > { %v792_v62 = vsel %vm1661_vm1, %v784_v58, %v791_v60  ;;  %v802_v63 = vsel %vm1634_vm5, %v793_v61, %v801_v57 }
 0x159   : > { %800 = vst [vmem:[#allocation2 + $0x8] sm:$0xf] %v792_v62  ;;  %803 = vst [vmem:[#allocation2 + $0x10] sm:$0x1] %v802_v63 }
 0x15e   : > { %v804_v0 = vld [vmem:[#allocation2] sm:$0xff] }
 0x15f   : > { %v1078_v26 = vld [vmem:[#allocation2] sm:$0xee] }
 0x160   : > { %v805_v2 = vld [vmem:[#allocation2 + $0x8] sm:$0xff]  ;;  %v824_v3 = vld [vmem:[#allocation2 + $0x10] sm:$0x11] }
 0x161   : > { %v1395_v4 = vcombine.high %v804_v0, %v805_v2  ;;  %v1397_v6 = vcombine.high %v824_v3, %v824_v3  ;;  %v1394_v7 = vcombine.low %v804_v0, %v805_v2  ;;  %v1396_v10 = vcombine.low %v824_v3, %v824_v3 }
 0x162   : > { %v1436_v11 = vcombine.low %v1078_v26, %v805_v2  ;;  %v1437_v37 = vcombine.high %v1078_v26, %v805_v2 }
 0x163   : > { %v872_v12 = vshll.u32 %v1395_v4, 16  ;;  %v877_v13 = vshll.u32 %v1397_v6, 16  ;;  %v860_v14 = vshll.u32 %v1394_v7, 16  ;;  %v865_v15 = vshll.u32 %v1396_v10, 16 }
 0x164   : > { %v870_v21 = vshrl.u32 %v1395_v4, 16  ;;  %v1103_v17 = vrot.slane %v1436_v11, 1  ;;  %v1104_v5 = vrot.slane %v1396_v10, 1  ;;  %v858_v18 = vshrl.u32 %v1394_v7, 16 }
 0x165   : > { %v874_v16 = vrot.slane %v872_v12, 1  ;;  %v862_v19 = vrot.slane %v860_v14, 1  ;;  %v879_v22 = vrot.slane %v877_v13, 1  ;;  %v867_v25 = vrot.slane %v865_v15, 1 }
 0x166   : > { %v1831_v23 = vsel %vm643_vm4, %v1103_v17, %v1104_v5  ;;  %v1106_v39 = vrot.slane %v1437_v37, 1  ;;  %v1107_v40 = vrot.slane %v1397_v6, 1 }
 0x167   : > { %v875_v20 = vor.u32 %v874_v16, %v870_v21  ;;  %v863_v24 = vor.u32 %v862_v19, %v858_v18 }
 0x168   : > { %v1108_v42 = vsel %vm643_vm4, %v1106_v39, %v1107_v40 }
 0x169   : > { %v880_v28 = vsel %vm395_vm2, %v875_v20, %v879_v22  ;;  %v868_v29 = vsel %vm395_vm2, %v863_v24, %v867_v25 }
 0x16a   : > { %1407 = vmatprep.mubr.msk.bf16.mxu1 %vm475_vm3, %v880_v28 }
 0x16b   : > { %972 = vmatmul.mubr.bf16.vlgmr.msra.gmra.mrb[0].mxu1 %v868_v29 }
 0x16c   : > { %1038 = vmatpush1.bf16.msra.mxu1 %v1529_v27  ;;  %1417 = vmatprep.mubr.msk.bf16.mxu1 %vm475_vm3, %v1395_v4 }
 0x16d   : > { %1039 = vmatprep.subr.bf16.mxu1 %v1557_v1 }
 0x170   : > { %1040 = vmatpush1.bf16.msra.mxu1 %v1530_v30 }
 0x171   : > { %1041 = vmatprep.subr.bf16.mxu1 %v1557_v1 }
 0x174   : > { %1042 = vmatpush1.bf16.msra.mxu1 %v1531_v31 }
 0x175   : > { %1043 = vmatprep.subr.bf16.mxu1 %v1557_v1 }
 0x178   : > { %1044 = vmatpush1.bf16.msra.mxu1 %v1532_v32 }
 0x179   : > { %1045 = vmatprep.subr.bf16.mxu1 %v1557_v1 }
 0x17c   : > { %1046 = vmatpush1.bf16.msra.mxu1 %v1533_v33 }
 0x17d   : > { %1047 = vmatprep.subr.bf16.mxu1 %v1557_v1 }
 0x180   : > { %1048 = vmatpush1.bf16.msra.mxu1 %v1534_v34 }
 0x181   : > { %1049 = vmatprep.subr.bf16.mxu1 %v1557_v1 }
 0x184   : > { %1050 = vmatpush1.bf16.msra.mxu1 %v1535_v35 }
 0x185   : > { %1051 = vmatprep.subr.bf16.mxu1 %v1557_v1 }
 0x188   : > { %1052 = vmatpush1.bf16.msra.mxu1 %v1536_v36 }
 0x189   : > { %1053 = vmatprep.subr.bf16.mxu1 %v1557_v1 }
 0x18c   : > { %1054 = vmatpush1.bf16.msra.mxu1 %v1537_v38 }
 0x18d   : > { %1167 = vmatprep.subr.bf16.mxu1 %v1557_v1 }
 0x18f   : > { %1070 = vmatmul.mubr.bf16.vlgmr.msra.gmra.mrb[0].mxu1 %v1394_v7 }
 0x190   : > { %1168 = vmatpush1.bf16.msra.mxu1 %v1538_v41  ;;  %1447 = vmatprep.mubr.msk.bf16.mxu1 %vm475_vm3, %v1108_v42 }
 0x191   : > { %1169 = vmatprep.subr.bf16.mxu1 %v1557_v1 }
 0x194   : > { %1170 = vmatpush1.bf16.msra.mxu1 %v1540_v43 }
 0x195   : > { %1171 = vmatprep.subr.bf16.mxu1 %v1557_v1 }
 0x198   : > { %1172 = vmatpush1.bf16.msra.mxu1 %v1541_v44 }
 0x199   : > { %1173 = vmatprep.subr.bf16.mxu1 %v1557_v1 }
 0x19c   : > { %1174 = vmatpush1.bf16.msra.mxu1 %v1542_v45 }
 0x19d   : > { %1175 = vmatprep.subr.bf16.mxu1 %v1557_v1 }
 0x1a0   : > { %1176 = vmatpush1.bf16.msra.mxu1 %v1543_v46 }
 0x1a1   : > { %1177 = vmatprep.subr.bf16.mxu1 %v1557_v1 }
 0x1a4   : > { %1178 = vmatpush1.bf16.msra.mxu1 %v1544_v47 }
 0x1a5   : > { %1179 = vmatprep.subr.bf16.mxu1 %v1557_v1 }
 0x1a8   : > { %1180 = vmatpush1.bf16.msra.mxu1 %v1545_v48 }
 0x1a9   : > { %1181 = vmatprep.subr.bf16.mxu1 %v1557_v1 }
 0x1ac   : > { %1182 = vmatpush1.bf16.msra.mxu1 %v1546_v49 }
 0x1ad   : > { %1183 = vmatprep.subr.bf16.mxu1 %v1557_v1 }
 0x1b0   : > { %1184 = vmatpush1.bf16.msra.mxu1 %v1547_v50 }
 0x1b3   : > { %1200 = vmatmul.mubr.bf16.vlgmr.msra.gmra.mrb[0].mxu1 %v1831_v23 }
 0x286   : > { %v1201_v52 = vpop.f32.mrb[0].mxu1 }
 0x287   : > { %v1217_v54 = vmul.f32 %v1448_v51, %v1201_v52  ;;  %v1203_v55 = vpop.f32.mrb[1].mxu1 }
 0x288   : > { %v1204_v56 = vpop.f32.mrb[2].mxu1 }
 0x289   : > { %v1226_v57 = vadd.f32 %v1449_v53, %v1217_v54  ;;  %v1218_v58 = vmul.f32 %v1448_v51, %v1204_v56  ;;  %v1206_v59 = vpop.f32.mrb[3].mxu1 }
 0x28b   : > { %v1228_v1 = vadd.f32 %v1226_v57, %v1640_v8  ;;  %v1227_v60 = vadd.f32 %v1449_v53, %v1218_v58 }
 0x28d   : > { %v1230_v61 = vmax.f32 %v1228_v1, 0.0  ;;  %v1229_v62 = vadd.f32 %v1227_v60, %v1642_v9 }
 0x28f   : > { %1232 = vst [vmem:[%s278_s27] sm:$0xff] %v1230_v61  ;;  %v1231_v63 = vmax.f32 %v1229_v62, 0.0 }
 0x291   : > { %1233 = vst [vmem:[%s278_s27 + $0x8] sm:$0xff] %v1231_v63 }
 0x292 PF: > { %s17_s24 = sadd.s32 1, %s1555_s24  }
 0x293   : > { %p14_p4 = scmp.ge.s32.totalorder %s17_s24, 4  }
 0x295   :  { %16 = sbr.rel (!%p14_p4) target bundleno = 1 (0x1), region = 82 }

</bundles_post_ra>
